<compile_context>
chip_gen: v7x
topology: tpu7x:2x2x1
jax: 0.10.0
libtpu: 0.0.40
codegen_flags: <defaults>
</compile_context>

<pallas_src>
import math

import jax
import jax.numpy as jnp
from jax.experimental import pallas as pl
from jax.experimental.pallas import tpu as pltpu

_HALF_PI = math.pi / 2.0
_F32_EPS = float(jnp.finfo(jnp.float32).eps)


def _rope_cache_kernel(theta_scaled_ref, lane_phase_ref, out_ref):
    """One (tile_rows, lanes) tile of the interleaved rotary cache.

    Precomputed per-lane rows (l = lane index, dim = 2*half):
        theta_scaled[l] = fold * theta[(l % dim) // 2]
        lane_phase[l]   = (l // dim) * theta[(l % dim) // 2] - (l & 1) * pi/2
    so for folded row r:  out[r, l] = cos(r * theta_scaled[l] + lane_phase[l])
    (even lanes -> cos(seq*theta), odd lanes -> sin(seq*theta) via the -pi/2 shift;
     a single EUP transcendental per output element).
    """
    tile_rows = out_ref.shape[0]
    row0 = (pl.program_id(0) * tile_rows).astype(jnp.float32)
    row_f = (jax.lax.broadcasted_iota(jnp.int32, (tile_rows, 1), 0)
             .astype(jnp.float32) + row0)                       # (R, 1)
    out_ref[...] = jnp.cos(row_f * theta_scaled_ref[...] + lane_phase_ref[...])


def _pick_block_bytes() -> int:
    """Generation-aware per-block output budget (double-buffered by the pipeline)."""
    vmem = None
    try:
        vmem = getattr(pltpu.get_tpu_info(), "vmem_capacity_bytes", None)
    except Exception:
        vmem = None
    if vmem is not None and vmem <= 64 * 1024 * 1024:
        return 6 * 1024 * 1024      # v7x-class (64 MiB VMEM/TC): ~12 MiB double-buffered
    return 12 * 1024 * 1024         # v5e / v6e (128 MiB VMEM): ~24 MiB double-buffered


def rotary_embedding_forward(max_seq_len: int, dim: int, base: float = 10000.0):
    """Equivalent of RotaryEmbedding(dim).forward(max_seq_len) with f32 inv_freq."""
    assert dim % 2 == 0, "rotary dim must be even"
    half = dim // 2
    two_half = 2 * half                                   # == dim

    # ---- Lane folding: pack `fold` consecutive seq positions per output row so the
    # lane width is a LARGE multiple of 128 (unmasked, lane-dense vector stores).
    fold = 128 // math.gcd(two_half, 128)                 # power of 2; lanes % 128 == 0
    while fold * two_half < 1024 and fold * 2 <= max(2, max_seq_len):
        fold *= 2                                         # widen toward ~1024 lanes
    lanes = fold * two_half
    rows_total = -(-max_seq_len // fold)                  # seq padded up to fold multiple
    padded_seq = rows_total * fold

    # ---- Hoisted per-lane constant rows (removes all per-element integer index math).
    inv_freq = 1.0 / (base ** (jnp.arange(0, dim, 2, dtype=jnp.float32) / dim))  # (half,)
    theta_lane = jnp.tile(jnp.repeat(inv_freq, 2), fold)                         # (lanes,)
    sub_seq = jnp.repeat(jnp.arange(fold, dtype=jnp.float32), two_half)          # (lanes,)
    parity = jnp.tile(jnp.arange(2, dtype=jnp.float32), lanes // 2)              # (lanes,)
    theta_scaled = (float(fold) * theta_lane).reshape(1, lanes)   # fold pow2 -> exact scale
    lane_phase = (sub_seq * theta_lane - parity * _HALF_PI).reshape(1, lanes)

    # ---- Generation-aware output tile, with >=4 grid steps when the cache allows
    # (keeps both v7x TensorCores busy and overlaps compute with HBM writeback).
    block_bytes = _pick_block_bytes()
    bytes_per_row = lanes * 4
    if rows_total <= 8:
        tile_rows = rows_total                            # block == full array dims
    else:
        tile_rows = max(8, (block_bytes // bytes_per_row) // 8 * 8)
        cap4 = (rows_total // 4) // 8 * 8
        cap2 = (rows_total // 2) // 8 * 8
        if cap4 >= 8:
            tile_rows = min(tile_rows, cap4)
        elif cap2 >= 8:
            tile_rows = min(tile_rows, cap2)
        tile_rows = min(tile_rows, rows_total)
    grid = (-(-rows_total // tile_rows),)

    block_out_bytes = tile_rows * lanes * 4
    vmem_limit = max(32 * 1024 * 1024, 2 * block_out_bytes + (8 << 20))

    flat = pl.pallas_call(
        _rope_cache_kernel,
        out_shape=jax.ShapeDtypeStruct((rows_total, lanes), jnp.float32),
        grid=grid,
        in_specs=[pl.BlockSpec((1, lanes), lambda i: (0, 0)),
                  pl.BlockSpec((1, lanes), lambda i: (0, 0))],
        out_specs=pl.BlockSpec((tile_rows, lanes), lambda i: (i, 0)),
        compiler_params=pltpu.CompilerParams(
            dimension_semantics=("parallel",),
            vmem_limit_bytes=vmem_limit),
        cost_estimate=pl.CostEstimate(
            flops=2 * rows_total * lanes,
            transcendentals=rows_total * lanes,
            bytes_accessed=rows_total * lanes * 4 + 2 * lanes * 4),
    )(theta_scaled, lane_phase)

    # (rows_total, fold*dim) -> (padded_seq, half, 2): contiguous row-major reshape.
    cache = flat.reshape(padded_seq, half, 2)
    if padded_seq != max_seq_len:
        cache = cache[:max_seq_len]
    # inv_freq dtype is float32 here, so no bf16/f16 downcast (matches PyTorch branch).
    return cache


def _reference(max_seq_len: int, dim: int, base: float = 10000.0):
    theta = 1.0 / (base ** (jnp.arange(0, dim, 2, dtype=jnp.float32) / dim))
    seq_idx = jnp.arange(max_seq_len, dtype=jnp.float32)
    idx_theta = jnp.outer(seq_idx, theta).astype(jnp.float32)
    return jnp.stack([jnp.cos(idx_theta), jnp.sin(idx_theta)], axis=-1)


if __name__ == "__main__":
    # Module has no random parameters; key kept only for convention.
    key = jax.random.PRNGKey(0)
    del key

    # (8, 32): small primary shape.  (300, 96): exercises the generalized fold
    # (dim not dividing 128), sequence padding, partial last tile, multi-step grid.
    for max_seq_len, dim in ((8, 32), (300, 96)):
        cache = jax.block_until_ready(rotary_embedding_forward(max_seq_len, dim))
        ref = _reference(max_seq_len, dim)
        assert cache.shape == (max_seq_len, dim // 2, 2), cache.shape
        assert cache.dtype == jnp.float32, cache.dtype
        # sin lanes come from cos(x - pi/2) with the angle assembled from two f32
        # rounded terms; the residual phase error grows ~ulp(max angle), so the
        # tolerance scales with max_seq_len (still 1e-5-tight at small seq).
        atol = max(1e-5, 8.0 * _F32_EPS * max_seq_len)
        err = float(jnp.max(jnp.abs(cache - ref)))
        assert jnp.allclose(cache, ref, atol=atol, rtol=1e-5), (max_seq_len, dim, err)

    print("KERNEL_OK")
</pallas_src>

<mosaic_0001>
module attributes {stable_mosaic.version = 11 : i64} {
  func.func @_rope_cache_kernel(%arg0: i32, %arg1: memref<1x256xf32, #tpu.memory_space<vmem>>, %arg2: memref<1x256xf32, #tpu.memory_space<vmem>>, %arg3: memref<1x256xf32, #tpu.memory_space<vmem>>) attributes {dimension_semantics = [#tpu.dimension_semantics<parallel>], iteration_bounds = array<i64: 1>, scalar_prefetch = 0 : i64, scratch_operands = 0 : i64, tpu.core_type = #tpu.core_type<tc>, window_params = [{pipeline_mode = #tpu.pipeline_mode<synchronous>, transform_indices = @transform_0, window_bounds = array<i64: 1, 256>}, {pipeline_mode = #tpu.pipeline_mode<synchronous>, transform_indices = @transform_1, window_bounds = array<i64: 1, 256>}, {transform_indices = @transform_2, window_bounds = array<i64: 1, 256>}]} {
    %c1_i32 = arith.constant 1 : i32
    %0 = arith.muli %arg0, %c1_i32 : i32
    %1 = arith.sitofp %0 : i32 to f32
    %2 = tpu.iota {dimensions = array<i32: 0>} : vector<1x1xi32>
    %3 = arith.sitofp %2 : vector<1x1xi32> to vector<1x1xf32>
    %4 = vector.broadcast %1 : f32 to vector<1x1xf32>
    %5 = arith.addf %3, %4 : vector<1x1xf32>
    %c0 = arith.constant 0 : index
    %c0_0 = arith.constant 0 : index
    %6 = vector.load %arg1[%c0, %c0_0] : memref<1x256xf32, #tpu.memory_space<vmem>>, vector<1x256xf32>
    %7 = vector.broadcast %5 : vector<1x1xf32> to vector<1x256xf32>
    %8 = arith.mulf %7, %6 : vector<1x256xf32>
    %c0_1 = arith.constant 0 : index
    %c0_2 = arith.constant 0 : index
    %9 = vector.load %arg2[%c0_1, %c0_2] : memref<1x256xf32, #tpu.memory_space<vmem>>, vector<1x256xf32>
    %10 = arith.addf %8, %9 : vector<1x256xf32>
    %11 = math.cos %10 : vector<1x256xf32>
    %c0_3 = arith.constant 0 : index
    %c0_4 = arith.constant 0 : index
    %12 = vector.load %arg3[%c0_3, %c0_4] : memref<1x256xf32, #tpu.memory_space<vmem>>, vector<1x256xf32>
    tpu.vector_store %arg3[%c0_3, %c0_4], %11 {strides = array<i32>} : memref<1x256xf32, #tpu.memory_space<vmem>>, vector<1x256xf32>,
    return
  }
  func.func @transform_0(%arg0: i32) -> (i32, i32) {
    %c0_i32 = arith.constant 0 : i32
    %c0_i32_0 = arith.constant 0 : i32
    %c0_i32_1 = arith.constant 0 : i32
    return %c0_i32, %c0_i32_0 : i32, i32
  }
  func.func @transform_1(%arg0: i32) -> (i32, i32) {
    %c0_i32 = arith.constant 0 : i32
    %c0_i32_0 = arith.constant 0 : i32
    %c0_i32_1 = arith.constant 0 : i32
    return %c0_i32, %c0_i32_0 : i32, i32
  }
  func.func @transform_2(%arg0: i32) -> (i32, i32) {
    %c0_i32 = arith.constant 0 : i32
    %c0_i32_0 = arith.constant 0 : i32
    return %arg0, %c0_i32 : i32, i32
  }
}

</mosaic_0001>

<bundles_post_ra>
// kernel: tpu_custom_call.1
= control target key start
LH: loop header
LB: loop body
LE: loop exit
PB: predicated region body
PF: predicated region fallthrough
CT: control target
= control target key end

     0   :  { %7 = vsyncpa [#allocation3], 0  ;;  %s532_s0 = inlined_call_operand.hbm [shape: f32[1,256], index: 0, kind: input, shape index: {}]   ;;  %s533_s1 = inlined_call_operand.vmem [shape: f32[1,256], index: 1, kind: input, shape index: {}]   ;;  %s534_s2 = inlined_call_operand.hbm [shape: f32[1,256], index: 2, kind: output, shape index: {}]  }
   0x1   :  { %8 = vsyncpa [#allocation4], 0  ;;  %s383_s9 = smov [#allocation2]   ;;  %s335_s13 = scalar_lea.hbm %s532_s0, 32 }
   0x2   :  { %s15_s10 = sshll.u32 %s383_s9, 4  ;;  %p336_p0 = scmp.ne.s32.totalorder %s532_s0, %s335_s13  ;;  %s16_s10 = int_to_ptr.vmem [resolvable:$true] %s15_s10 }
   0x3   :  { %p339_p1 = scmp.lt.u32.totalorder %s335_s13, %s532_s0 }
   0x5   :  { %p341_p2 = pnand %p339_p1, %p336_p0 }
   0x7   :  { %344 = shalt.err (!%p341_p2)
}
   0x8   :  { %s345_s18 = scalar_lea.vmem %s16_s10, 32  ;;  %p350_p4 = scmp.lt.s32.totalorder %s16_s10, %s16_s10 }
   0x9   :  { %p346_p3 = scmp.ne.s32.totalorder %s16_s10, %s345_s18  ;;  %p351_p5 = scmp.lt.s32.totalorder %s345_s18, %s345_s18 }
   0xb   :  { %p352_p6 = por %p351_p5, %p350_p4 }
   0xd   :  { %p353_p7 = pnand %p352_p6, %p346_p3 }
   0xf   :  { %356 = shalt.err (!%p353_p7)
}
  0x10   :  { %18 = dma.hbm_to_vmem [thread:$0]  %s532_s0, 32, %s16_s10, [#allocation3]  }
  0x11   :  { %379 = dma.done.wait [#allocation3], 32  }
  0x12   :  { %380 = vsyncadd [#allocation3], 4294967264  ;;  %v25_v0 = vlaneseq  ;;  %v30_v5 = vld [vmem:[#allocation2] sm:$0x3]  ;;  %v384_v37 = vmov 683565275  }
  0x13   :  { %v44_v6 = vld [vmem:[%s533_s1] sm:$0x3]  ;;  %v385_v39 = vmov 2475754826   ;;  %v386_v41 = vmov 2131351028  }
  0x14   :  { %v420_v1 = vshrl.u32 %v25_v0, 7  ;;  %v387_v43 = vmov 2102212464   ;;  %v388_v45 = vmov 920167782   ;;  %s391_s0 = smov [#allocation5]  }
  0x15   :  { %v389_v53 = vmov 1326507024   ;;  %s293_s1 = sshll.u32 %s391_s0, 4  ;;  %s294_s1 = int_to_ptr.vmem [resolvable:$true] %s293_s1 }
  0x16   :  { %v34_v2 = vsub.s32 0, %v420_v1  ;;  %v38_v3 = vsub.s32 1, %v420_v1  ;;  %v27_v4 = vcvt.s32.f32 %v420_v1  ;;  %s357_s23 = scalar_lea.vmem %s294_s1, 32  ;;  %p362_p9 = scmp.lt.s32.totalorder %s294_s1, %s294_s1 }
  0x17   :  { %p358_p8 = scmp.ne.s32.totalorder %s294_s1, %s357_s23  ;;  %p363_p10 = scmp.lt.s32.totalorder %s357_s23, %s357_s23 }
  0x18   :  { %v35_v7 = vrot.slane %v30_v5, %v34_v2  ;;  %v39_v8 = vrot.slane %v30_v5, %v38_v3  ;;  %v49_v9 = vrot.slane %v44_v6, %v34_v2  ;;  %v53_v10 = vrot.slane %v44_v6, %v38_v3 }
  0x19   :  { %p364_p11 = por %p363_p10, %p362_p9 }
  0x1a   :  { %v42_v11 = vmul.f32 %v35_v7, %v27_v4  ;;  %v43_v12 = vmul.f32 %v39_v8, %v27_v4 }
  0x1b   :  { %p365_p12 = pnand %p364_p11, %p358_p8 }
  0x1c   :  { %v428_v13 = vadd.f32 %v49_v9, %v42_v11  ;;  %v430_v14 = vadd.f32 %v53_v10, %v43_v12 }
  0x1e   :  { %v58_v15 = vand.u32 2147483647, %v428_v13  ;;  %v61_v16 = vand.u32 2139095040, %v428_v13  ;;  %v161_v17 = vand.u32 2147483647, %v430_v14  ;;  %v164_v18 = vand.u32 2139095040, %v430_v14 }
  0x1f   :  { %vm60_vm14 = vcmp.lt.s32.totalorder %v428_v13, 0 }
  0x20   :  { %v62_v19 = vshrl.u32 %v61_v16, 23  ;;  %v65_v20 = vand.u32 8388607, %v58_v15  ;;  %v165_v21 = vshrl.u32 %v164_v18, 23  ;;  %v168_v22 = vand.u32 8388607, %v161_v17 }
  0x21   :  { %vm491_vm15 = vcmp.le.f32.partialorder %v58_v15, 0.7853982 }
  0x22   :  { %v302_v23 = vadd.s32 4294967169, %v62_v19  ;;  %v306_v24 = vadd.s32 4294967169, %v165_v21  ;;  %v66_v26 = vor.u32 8388608, %v65_v20  ;;  %v169_v27 = vor.u32 8388608, %v168_v22 }
  0x24   :  { %v68_v25 = vadd.s32 1, %v302_v23  ;;  %v171_v28 = vadd.s32 1, %v306_v24  ;;  %v440_v33 = vshll.u32 %v66_v26, 8  ;;  %v442_v35 = vshll.u32 %v169_v27, 8 }
  0x26   :  { %vm69_vm0 = vcmp.gt.s32.totalorder %v68_v25, 0  ;;  %vm172_vm1 = vcmp.gt.s32.totalorder %v171_v28, 0 }
  0x27   :  { %v70_v29 = vsel %vm69_vm0, %v68_v25, 0  ;;  %v173_v32 = vsel %vm172_vm1, %v171_v28, 0  ;;  %vm163_vm0 = vcmp.lt.s32.totalorder %v430_v14, 0  ;;  %vm505_vm1 = vcmp.le.f32.partialorder %v161_v17, 0.7853982 }
  0x28   :  { %v71_v30 = vshrl.u32 %v70_v29, 5  ;;  %v72_v31 = vand.u32 31, %v70_v29  ;;  %v175_v34 = vand.u32 31, %v173_v32  ;;  %v444_v47 = vshrl.u32 %v173_v32, 5 }
  0x2a   :  { %v73_v36 = vsub.s32 32, %v72_v31  ;;  %v75_v38 = vshll.u32 %v384_v37, %v72_v31  ;;  %v78_v40 = vshll.u32 %v385_v39, %v72_v31  ;;  %v81_v42 = vshll.u32 %v386_v41, %v72_v31 }
  0x2b   :  { %v84_v44 = vshll.u32 %v387_v43, %v72_v31  ;;  %v87_v46 = vshll.u32 %v388_v45, %v72_v31  ;;  %vm90_vm2 = vcmp.lt.s32.totalorder %v71_v30, 1  ;;  %vm91_vm3 = vcmp.lt.s32.totalorder %v71_v30, 2 }
  0x2c   :  { %v74_v48 = vshrl.u32 %v384_v37, %v73_v36  ;;  %v76_v49 = vshrl.u32 %v385_v39, %v73_v36  ;;  %v79_v50 = vshrl.u32 %v386_v41, %v73_v36  ;;  %v82_v51 = vshrl.u32 %v387_v43, %v73_v36 }
  0x2d   :  { %v85_v52 = vshrl.u32 %v388_v45, %v73_v36  ;;  %v88_v54 = vshrl.u32 %v389_v53, %v73_v36  ;;  %vm93_vm4 = vcmp.lt.s32.totalorder %v71_v30, 4  ;;  %v176_v58 = vsub.s32 32, %v175_v34 }
  0x2e   :  { %v77_v55 = vor.u32 %v76_v49, %v75_v38  ;;  %v80_v56 = vor.u32 %v79_v50, %v78_v40  ;;  %v83_v57 = vor.u32 %v82_v51, %v81_v42  ;;  %vm92_vm5 = vcmp.lt.s32.totalorder %v71_v30, 3 }
  0x2f   :  { %v86_v59 = vor.u32 %v85_v52, %v84_v44  ;;  %v89_v60 = vor.u32 %v88_v54, %v87_v46  ;;  %v178_v61 = vshll.u32 %v384_v37, %v175_v34  ;;  %v181_v7 = vshll.u32 %v385_v39, %v175_v34 }
  0x30   :  { %v94_v62 = vsel %vm90_vm2, %v74_v48, %v77_v55  ;;  %v95_v63 = vsel %vm93_vm4, %v83_v57, 2102212464  ;;  %v98_v2 = vsel %vm90_vm2, %v77_v55, %v80_v56  ;;  %v102_v3 = vsel %vm90_vm2, %v80_v56, %v83_v57 }
  0x31   :  { %v96_v4 = vsel %vm92_vm5, %v80_v56, %v95_v63  ;;  %v99_v5 = vsel %vm93_vm4, %v86_v59, 920167782  ;;  %v103_v6 = vsel %vm93_vm4, %v89_v60, 1326507024  ;;  %v177_v10 = vshrl.u32 %v384_v37, %v176_v58 }
  0x32   :  { %v100_v8 = vsel %vm92_vm5, %v83_v57, %v99_v5  ;;  %v104_v9 = vsel %vm92_vm5, %v86_v59, %v103_v6  ;;  %v179_v11 = vshrl.u32 %v385_v39, %v176_v58  ;;  %v97_v12 = vsel %vm91_vm3, %v94_v62, %v96_v4 }
  0x33   :  { %v101_v16 = vsel %vm91_vm3, %v98_v2, %v100_v8  ;;  %v105_v18 = vsel %vm91_vm3, %v102_v3, %v104_v9  ;;  %v182_v19 = vshrl.u32 %v386_v41, %v176_v58  ;;  %v184_v26 = vshll.u32 %v386_v41, %v175_v34 }
  0x34   :  { %v453_v20 = vmul.u32.u64.low %v440_v33, %v105_v18  ;;  %v454_v21 = vmul.u32.u64.high %v440_v33, %v105_v18, %v453_v20  ;;  %v457_v22 = vmul.u32.u64.low %v440_v33, %v101_v16  ;;  %v458_v23 = vmul.u32.u64.high %v440_v33, %v101_v16, %v457_v22 }
  0x35   :  { %v180_v24 = vor.u32 %v179_v11, %v178_v61  ;;  %v183_v25 = vor.u32 %v182_v19, %v181_v7  ;;  %v185_v27 = vshrl.u32 %v387_v43, %v176_v58  ;;  %v187_v28 = vshll.u32 %v387_v43, %v175_v34 }
  0x36   :  { %v188_v29 = vshrl.u32 %v388_v45, %v176_v58  ;;  %v190_v31 = vshll.u32 %v388_v45, %v175_v34  ;;  %v191_v32 = vshrl.u32 %v389_v53, %v176_v58  ;;  %v113_v30 = vmul.u32 %v440_v33, %v97_v12 }
  0x37   :  { %v186_v36 = vor.u32 %v185_v27, %v184_v26  ;;  %vm193_vm6 = vcmp.lt.s32.totalorder %v444_v47, 1  ;;  %vm194_vm7 = vcmp.lt.s32.totalorder %v444_v47, 2  ;;  %vm115_vm8 = vc.u32 %v454_v21, %v457_v22 }
  0x38   :  { %v116_v37 = vadd.s32 1, %v458_v23  ;;  %v189_v38 = vor.u32 %v188_v29, %v187_v28  ;;  %vm195_vm9 = vcmp.lt.s32.totalorder %v444_v47, 3  ;;  %v192_v39 = vor.u32 %v191_v32, %v190_v31 }
  0x39   :  { %vm196_vm10 = vcmp.lt.s32.totalorder %v444_v47, 4  ;;  %v197_v40 = vsel %vm193_vm6, %v177_v10, %v180_v24  ;;  %v201_v34 = vsel %vm193_vm6, %v180_v24, %v183_v25  ;;  %v205_v43 = vsel %vm193_vm6, %v183_v25, %v186_v36 }
  0x3a   :  { %v117_v41 = vsel %vm115_vm8, %v116_v37, %v458_v23  ;;  %v198_v33 = vsel %vm196_vm10, %v186_v36, 2102212464  ;;  %v202_v42 = vsel %vm196_vm10, %v189_v38, 920167782  ;;  %v206_v48 = vsel %vm196_vm10, %v192_v39, 1326507024 }
  0x3b   :  { %v118_v44 = vadd.s32 %v117_v41, %v113_v30  ;;  %v199_v45 = vsel %vm195_vm9, %v183_v25, %v198_v33  ;;  %v203_v46 = vsel %vm195_vm9, %v186_v36, %v202_v42  ;;  %v207_v51 = vsel %vm195_vm9, %v189_v38, %v206_v48 }
  0x3c   :  { %v200_v49 = vsel %vm194_vm7, %v197_v40, %v199_v45  ;;  %v204_v50 = vsel %vm194_vm7, %v201_v34, %v203_v46  ;;  %v208_v53 = vsel %vm194_vm7, %v205_v43, %v207_v51  ;;  %v114_v10 = vadd.s32 %v457_v22, %v454_v21 }
  0x3d   :  { %v119_v52 = vadd.s32 536870912, %v118_v44  ;;  %v475_v54 = vmul.u32.u64.low %v442_v35, %v204_v50  ;;  %v476_v55 = vmul.u32.u64.high %v442_v35, %v204_v50, %v475_v54  ;;  %v216_v59 = vmul.u32 %v442_v35, %v200_v49 }
  0x3e   :  { %v479_v56 = vmul.u32.u64.low %v442_v35, %v208_v53  ;;  %v480_v57 = vmul.u32.u64.high %v442_v35, %v208_v53, %v479_v56  ;;  %vm150_vm6 = vweird.f32 %v428_v13  ;;  %vm253_vm9 = vweird.f32 %v430_v14 }
  0x3f   :  { %v120_v58 = vshrl.u32 %v119_v52, 30  ;;  %v219_v61 = vadd.s32 1, %v476_v55  ;;  %vm284_vm10 = vcmp.lt.s32.totalorder %v25_v0, 256 }
  0x40   :  { %vm218_vm11 = vc.u32 %v480_v57, %v475_v54  ;;  %v217_v31 = vadd.s32 %v475_v54, %v480_v57 }
  0x41   :  { %v121_v60 = vshll.u32 %v120_v58, 30  ;;  %v220_v47 = vsel %vm218_vm11, %v219_v61, %v476_v55  ;;  %v144_v46 = vsub.s32 4, %v120_v58 }
  0x42   :  { %v221_v63 = vadd.s32 %v220_v47, %v216_v59  ;;  %v390_v47 = vmov 1966171168  }
  0x43   :  { %v122_v62 = vsub.s32 %v118_v44, %v121_v60  ;;  %v145_v49 = vsel %vm60_vm14, %v144_v46, %v120_v58 }
  0x44   :  { %v222_v3 = vadd.s32 536870912, %v221_v63  ;;  %v147_v53 = vsel %vm491_vm15, 0, %v145_v49 }
  0x45   :  { %v124_v2 = vsub.s32 0, %v122_v62  ;;  %v151_v58 = vand.u32 3, %v147_v53 }
  0x46   :  { %v223_v5 = vshrl.u32 %v222_v3, 30 }
  0x47   :  { %v303_v4 = vmin.u32 %v124_v2, %v122_v62  ;;  %vm153_vm2 = vcmp.eq.s32.totalorder %v151_v58, 0  ;;  %vm156_vm3 = vcmp.eq.s32.totalorder %v151_v58, 2  ;;  %vm152_vm4 = vcmp.lt.s32.totalorder %v151_v58, 2 }
  0x48   :  { %v224_v7 = vshll.u32 %v223_v5, 30  ;;  %v247_v52 = vsub.s32 4, %v223_v5 }
  0x49   :  { %v126_v6 = vclz %v303_v4 }
  0x4a   :  { %v225_v9 = vsub.s32 %v221_v63, %v224_v7  ;;  %v248_v56 = vsel %vm163_vm0, %v247_v52, %v223_v5  ;;  %v268_v63 = vunpack.c.l.s4 %v390_v47 }
  0x4b   :  { %v304_v8 = vadd.s32 4294967294, %v126_v6  ;;  %v250_v17 = vsel %vm505_vm1, 0, %v248_v56 }
  0x4c   :  { %v227_v11 = vsub.s32 0, %v225_v9  ;;  %v269_v5 = vunpack.c.0.s8 %v268_v63 }
  0x4d   :  { %vm305_vm12 = vcmp.lt.s32.totalorder %v304_v8, 0 }
  0x4e   :  { %v129_v35 = vsel %vm305_vm12, 0, %v304_v8  ;;  %v307_v19 = vmin.u32 %v227_v11, %v225_v9 }
  0x4f   :  { %v130_v12 = vsub.s32 32, %v129_v35  ;;  %v131_v16 = vshll.u32 %v122_v62, %v129_v35  ;;  %v134_v18 = vsub.s32 4294967266, %v129_v35  ;;  %v254_v62 = vand.u32 3, %v250_v17 }
  0x50   :  { %v229_v24 = vclz %v307_v19 }
  0x51   :  { %v132_v20 = vshrl.u32 %v114_v10, %v130_v12  ;;  %v135_v23 = vadd.s32 127, %v134_v18  ;;  %vm259_vm5 = vcmp.eq.s32.totalorder %v254_v62, 2  ;;  %vm256_vm7 = vcmp.eq.s32.totalorder %v254_v62, 0 }
  0x52   :  { %v308_v27 = vadd.s32 4294967294, %v229_v24  ;;  %vm255_vm8 = vcmp.lt.s32.totalorder %v254_v62, 2 }
  0x53   :  { %v133_v25 = vor.u32 %v132_v20, %v131_v16  ;;  %v136_v26 = vshll.u32 %v135_v23, 23  ;;  %v272_v16 = vsub.s32 %v269_v5, %v420_v1 }
  0x54   :  { %vm309_vm13 = vcmp.lt.s32.totalorder %v308_v27, 0 }
  0x55   :  { %v137_v28 = vor.u32 4788187, %v136_v26  ;;  %v140_v29 = vcvt.s32.f32 %v133_v25  ;;  %v232_v21 = vsel %vm309_vm13, 0, %v308_v27 }
  0x56   :  { %v233_v22 = vsub.s32 32, %v232_v21  ;;  %v234_v30 = vshll.u32 %v225_v9, %v232_v21  ;;  %v237_v36 = vsub.s32 4294967266, %v232_v21 }
  0x57   :  { %v138_v32 = vand.u32 2147483647, %v137_v28 }
  0x58   :  { %v235_v38 = vshrl.u32 %v217_v31, %v233_v22  ;;  %v238_v39 = vadd.s32 127, %v237_v36 }
  0x59   :  { %v141_v37 = vmul.f32 %v140_v29, %v138_v32 }
  0x5a   :  { %v236_v41 = vor.u32 %v235_v38, %v234_v30  ;;  %v239_v33 = vshll.u32 %v238_v39, 23 }
  0x5b   :  { %v142_v34 = vxor.u32 2147483648, %v141_v37 }
  0x5c   :  { %v240_v44 = vor.u32 4788187, %v239_v33  ;;  %v243_v45 = vcvt.s32.f32 %v236_v41 }
  0x5d   :  { %v143_v42 = vsel %vm60_vm14, %v142_v34, %v141_v37 }
  0x5e   :  { %v146_v43 = vsel %vm491_vm15, %v428_v13, %v143_v42  ;;  %v241_v48 = vand.u32 2147483647, %v240_v44 }
  0x5f   :  { %327 = vcosq.f32 %v146_v43 }
  0x60   :  { %329 = vsinq.f32 %v146_v43  ;;  %v244_v15 = vmul.f32 %v243_v45, %v241_v48 }
  0x62   :  { %v245_v51 = vxor.u32 2147483648, %v244_v15 }
  0x64   :  { %v246_v54 = vsel %vm163_vm0, %v245_v51, %v244_v15 }
  0x65   :  { %v249_v55 = vsel %vm505_vm1, %v430_v14, %v246_v54 }
  0x66   :  { %331 = vcosq.f32 %v249_v55 }
  0x67   :  { %333 = vsinq.f32 %v249_v55 }
  0x69   :  { %v328_v57 = vpop.eup %327 }
  0x6a   :  { %v330_v59 = vpop.eup %329  ;;  %v157_v61 = vxor.u32 2147483648, %v328_v57 }
  0x6b   :  { %v154_v60 = vxor.u32 2147483648, %v330_v59 }
  0x6c   :  { %v158_v3 = vsel %vm156_vm3, %v157_v61, %v330_v59 }
  0x6d   :  { %v155_v2 = vsel %vm153_vm2, %v328_v57, %v154_v60 }
  0x6e   :  { %v159_v7 = vsel %vm152_vm4, %v155_v2, %v158_v3 }
  0x6f   :  { %v160_v35 = vsel %vm150_vm6, nan, %v159_v7 }
  0x70   :  { %v332_v4 = vpop.eup %331 }
  0x71   :  { %v334_v6 = vpop.eup %333  ;;  %v260_v8 = vxor.u32 2147483648, %v332_v4 }
  0x72   :  { %v257_v9 = vxor.u32 2147483648, %v334_v6 }
  0x73   :  { %v261_v10 = vsel %vm259_vm5, %v260_v8, %v334_v6 }
  0x74   :  { %v258_v11 = vsel %vm256_vm7, %v332_v4, %v257_v9 }
  0x75   :  { %v262_v12 = vsel %vm255_vm8, %v258_v11, %v261_v10 }
  0x76   :  { %v263_v18 = vsel %vm253_vm9, nan, %v262_v12 }
  0x77   :  { %v266_v19 = vcombine.low %v160_v35, %v263_v18 }
  0x79   :  { %v273_v20 = vrot.slane %v266_v19, %v272_v16 }
  0x7b   :  { %v280_v13 = vrot.slane %v273_v20, %v272_v16 }
  0x7d   :  { %286 = vst.msk [vmem:[#allocation5] sm:$0x3] %vm284_vm10, %v280_v13 }
  0x7e   :  { %368 = shalt.err (!%p365_p12)
}
  0x7f   :  { %s369_s26 = scalar_lea.hbm %s534_s2, 32 }
  0x80   :  { %p370_p13 = scmp.ne.s32.totalorder %s534_s2, %s369_s26  ;;  %p373_p0 = scmp.lt.u32.totalorder %s369_s26, %s534_s2 }
  0x82   :  { %p375_p1 = pnand %p373_p0, %p370_p13 }
  0x84   :  { %378 = shalt.err (!%p375_p1)
}
  0x85   :  { %296 = dma.vmem_to_hbm [thread:$0]  %s294_s1, 32, %s534_s2, [#allocation4]  }
  0x86   :  { %381 = dma.done.wait [#allocation4], 32  }
  0x87   :  { %382 = vsyncadd [#allocation4], 4294967264 }
  0x88   :  { %300 = vsyncpa [#allocation3], 1 }
  0x89   :  { %301 = vsyncpa [#allocation4], 1 }

</bundles_post_ra>
